<compile_context>
chip_gen: v5e
topology: v5e:2x2
jax: 0.10.0
libtpu: 0.0.40
codegen_flags: <defaults>
</compile_context>

<pallas_src>
import jax
import jax.numpy as jnp
from jax.experimental import pallas as pl
from jax.experimental.pallas import tpu as pltpu


def _round_up(x, m):
    return ((x + m - 1) // m) * m


def lora_kernel(x_ref, a_ref, b_ref, o_ref):
    # x_ref: (tm, in_features); a_ref: (in_features, rank); b_ref: (rank, tn)
    # First matmul: f32 accumulation on the MXU.
    xa = jnp.dot(x_ref[...], a_ref[...], preferred_element_type=jnp.float32)
    # Cast the tiny (tm, rank) intermediate to the weight dtype so the second
    # matmul stays on the MXU's native (bf16) path when weights are bf16; the
    # extra rounding is negligible at LoRA ranks (documented, intentional).
    out = jnp.dot(xa.astype(b_ref.dtype), b_ref[...],
                  preferred_element_type=jnp.float32)
    o_ref[...] = out.astype(o_ref.dtype)


def lora_forward(x, A, B, *, tm=256, tn=512, vmem_limit_bytes=None):
    """Compute (x @ A) @ B with a Pallas TPU kernel.

    x: (M, in_features); A: (in_features, rank); B: (rank, out_features).
    Tiles over M (rows) and out_features (lanes). A and the per-column slab of
    B are resident in VMEM across the row axis (never re-DMA'd per row step).
    For bf16 models, pass bf16 x/A/B: data movement halves, accumulation stays f32.
    """
    M, in_features = x.shape
    rank = A.shape[1]
    out_features = B.shape[1]
    out_dtype = x.dtype

    # ---- Tile selection (generation-aware defaults) ------------------------
    # Row tile: multiple of 8 sublanes (128+ preferred for the MXU M dim),
    # clamped for small problems so the grid still has >= 1 step.
    tm = min(tm, _round_up(M, 8))
    m_pad = _round_up(M, tm)
    # Lane tile: keep output blocks lane-dense (multiple of 128 -> unmasked vst);
    # a full-width block is always legal, even below 128 lanes.
    if out_features <= tn:
        tn = out_features
        n_pad = out_features
    else:
        tn = _round_up(tn, 128)
        n_pad = _round_up(out_features, tn)

    # Zero-pad ragged edges in plain JAX; padded rows/cols are sliced off below.
    if m_pad != M:
        x = jnp.pad(x, ((0, m_pad - M), (0, 0)))
    if n_pad != out_features:
        B = jnp.pad(B, ((0, 0), (0, n_pad - out_features)))

    grid = (m_pad // tm, n_pad // tn)

    # Advisory cost estimate: helps XLA schedule this call against the base
    # dense matmul the LoRA path is usually added to.
    flops = 2 * M * rank * (in_features + out_features)
    bytes_accessed = (x.size * x.dtype.itemsize
                      + A.size * A.dtype.itemsize
                      + B.size * B.dtype.itemsize
                      + m_pad * n_pad * jnp.dtype(out_dtype).itemsize)
    cost = pl.CostEstimate(flops=flops, transcendentals=0,
                           bytes_accessed=bytes_accessed)

    out = pl.pallas_call(
        lora_kernel,
        out_shape=jax.ShapeDtypeStruct((m_pad, n_pad), out_dtype),
        grid_spec=pltpu.PrefetchScalarGridSpec(
            num_scalar_prefetch=0,
            grid=grid,
            in_specs=[
                # x row slab; in_features kept whole (fits VMEM for typical
                # hidden sizes with bf16 + tm=256).
                # TODO(synk): for in_features >= ~8k add a K ("arbitrary") grid
                # axis with an f32 xa accumulator scratch to cap the x tile.
                pl.BlockSpec((tm, in_features), lambda i, j: (i, 0)),
                # A and the B column slab are tiny at LoRA ranks; constant
                # block index along the M axis keeps them resident in VMEM.
                pl.BlockSpec((in_features, rank), lambda i, j: (0, 0)),
                pl.BlockSpec((rank, tn), lambda i, j: (0, j)),
            ],
            out_specs=pl.BlockSpec((tm, tn), lambda i, j: (i, j)),
        ),
        compiler_params=pltpu.CompilerParams(
            # Both axes independent -> shard across TensorCores (v7x megacore).
            dimension_semantics=("parallel", "parallel"),
            # Raise on v5e/v6e when pushing tm/tn beyond the 32 MiB default
            # scoped VMEM; defaults here fit it (and v7x's 64 MiB physical).
            vmem_limit_bytes=vmem_limit_bytes,
        ),
        cost_estimate=cost,
    )(x, A, B)

    return out[:M, :out_features]


if __name__ == "__main__":
    # Small shapes consistent with the module: batch=2, seq=8, hidden=32, rank=4.
    batch, seq, in_features, out_features, rank = 2, 8, 32, 32, 4

    key = jax.random.PRNGKey(0)
    kx, ka, kb = jax.random.split(key, 3)

    # PyTorch __init__: A ~ N(0, 1) * 0.02, B = zeros. A zero B makes the output
    # identically zero (vacuous check), so we also verify with a nonzero B;
    # forward semantics y = (x @ A) @ B are identical either way.
    A = jax.random.normal(ka, (in_features, rank), dtype=jnp.float32) * 0.02
    B_init = jnp.zeros((rank, out_features), dtype=jnp.float32)
    B_test = jax.random.normal(kb, (rank, out_features), dtype=jnp.float32) * 0.1

    x = jax.random.normal(kx, (batch, seq, in_features), dtype=jnp.float32)
    x2d = x.reshape(batch * seq, in_features)  # glue reshape in plain JAX

    # 1) Module-default init (B = 0): output must be exactly zero.
    out0 = lora_forward(x2d, A, B_init)
    jax.block_until_ready(out0)
    assert jnp.allclose(out0, jnp.zeros_like(out0), atol=1e-6)

    # 2) f32 path with nonzero B: check against plain JAX reference.
    out_f32 = lora_forward(x2d, A, B_test)
    jax.block_until_ready(out_f32)
    ref = (x2d @ A) @ B_test
    assert jnp.allclose(out_f32, ref, atol=2e-3, rtol=2e-2)

    # 3) bf16 data movement (f32 accumulation in-kernel): loose check.
    out_bf16 = lora_forward(x2d.astype(jnp.bfloat16), A.astype(jnp.bfloat16),
                            B_test.astype(jnp.bfloat16))
    jax.block_until_ready(out_bf16)
    assert jnp.allclose(out_bf16.astype(jnp.float32), ref, atol=1e-2, rtol=5e-2)

    out3d = out_f32.reshape(batch, seq, out_features)
    jax.block_until_ready(out3d)

    print("KERNEL_OK")
</pallas_src>

<mosaic_0001>
module attributes {stable_mosaic.version = 11 : i64} {
  func.func @lora_kernel(%arg0: i32, %arg1: i32, %arg2: memref<16x32xf32, #tpu.memory_space<vmem>>, %arg3: memref<32x4xf32, #tpu.memory_space<vmem>>, %arg4: memref<4x32xf32, #tpu.memory_space<vmem>>, %arg5: memref<16x32xf32, #tpu.memory_space<vmem>>) attributes {dimension_semantics = [#tpu.dimension_semantics<parallel>, #tpu.dimension_semantics<parallel>], iteration_bounds = array<i64: 1, 1>, scalar_prefetch = 0 : i64, scratch_operands = 0 : i64, tpu.core_type = #tpu.core_type<tc>, window_params = [{transform_indices = @transform_0, window_bounds = array<i64: 16, 32>}, {pipeline_mode = #tpu.pipeline_mode<synchronous>, transform_indices = @transform_1, window_bounds = array<i64: 32, 4>}, {transform_indices = @transform_2, window_bounds = array<i64: 4, 32>}, {transform_indices = @transform_3, window_bounds = array<i64: 16, 32>}]} {
    %c0 = arith.constant 0 : index
    %c0_0 = arith.constant 0 : index
    %0 = vector.load %arg2[%c0, %c0_0] : memref<16x32xf32, #tpu.memory_space<vmem>>, vector<16x32xf32>
    %c0_1 = arith.constant 0 : index
    %c0_2 = arith.constant 0 : index
    %1 = vector.load %arg3[%c0_1, %c0_2] : memref<32x4xf32, #tpu.memory_space<vmem>>, vector<32x4xf32>
    %cst = arith.constant dense<0.000000e+00> : vector<16x4xf32>
    %2 = tpu.matmul %0, %1, %cst {dimension_numbers = #tpu.dot_dimension_numbers<[1], [0], [0], [1], [0, 0, 1, 1], [], []>} : vector<16x32xf32>, vector<32x4xf32>, vector<16x4xf32> -> vector<16x4xf32>
    %c0_3 = arith.constant 0 : index
    %c0_4 = arith.constant 0 : index
    %3 = vector.load %arg4[%c0_3, %c0_4] : memref<4x32xf32, #tpu.memory_space<vmem>>, vector<4x32xf32>
    %cst_5 = arith.constant dense<0.000000e+00> : vector<16x32xf32>
    %4 = tpu.matmul %2, %3, %cst_5 {dimension_numbers = #tpu.dot_dimension_numbers<[1], [0], [0], [1], [0, 0, 1, 1], [], []>} : vector<16x4xf32>, vector<4x32xf32>, vector<16x32xf32> -> vector<16x32xf32>
    %c0_6 = arith.constant 0 : index
    %c0_7 = arith.constant 0 : index
    %5 = vector.load %arg5[%c0_6, %c0_7] : memref<16x32xf32, #tpu.memory_space<vmem>>, vector<16x32xf32>
    tpu.vector_store %arg5[%c0_6, %c0_7], %4 {strides = array<i32>} : memref<16x32xf32, #tpu.memory_space<vmem>>, vector<16x32xf32>,
    return
  }
  func.func @transform_0(%arg0: i32, %arg1: i32) -> (i32, i32) {
    %c0_i32 = arith.constant 0 : i32
    %c0_i32_0 = arith.constant 0 : i32
    return %arg0, %c0_i32 : i32, i32
  }
  func.func @transform_1(%arg0: i32, %arg1: i32) -> (i32, i32) {
    %c0_i32 = arith.constant 0 : i32
    %c0_i32_0 = arith.constant 0 : i32
    %c0_i32_1 = arith.constant 0 : i32
    return %c0_i32, %c0_i32_0 : i32, i32
  }
  func.func @transform_2(%arg0: i32, %arg1: i32) -> (i32, i32) {
    %c0_i32 = arith.constant 0 : i32
    %c0_i32_0 = arith.constant 0 : i32
    return %c0_i32, %arg1 : i32, i32
  }
  func.func @transform_3(%arg0: i32, %arg1: i32) -> (i32, i32) {
    %c0_i32 = arith.constant 0 : i32
    return %arg0, %arg1 : i32, i32
  }
}

</mosaic_0001>

<bundles_post_ra>
// kernel: tpu_custom_call.1
= control target key start
LH: loop header
LB: loop body
LE: loop exit
PB: predicated region body
PF: predicated region fallthrough
CT: control target
= control target key end

     0   :  { %s196_s0 = inlined_call_operand.vmem [shape: f32[16,32], index: 0, kind: input, shape index: {}]   ;;  %s197_s1 = inlined_call_operand.vmem [shape: f32[32,4], index: 1, kind: input, shape index: {}]   ;;  %s198_s2 = inlined_call_operand.vmem [shape: f32[4,32], index: 2, kind: input, shape index: {}]   ;;  %s199_s3 = inlined_call_operand.hbm [shape: f32[16,32], index: 3, kind: output, shape index: {}]  }
   0x1   :  { %v20_v0 = vld [vmem:[%s197_s1 + $0x18] sm:$0xff]  ;;  %v19_v1 = vld [vmem:[%s197_s1 + $0x10] sm:$0xff]  ;;  %v18_v2 = vld [vmem:[%s197_s1 + $0x8] sm:$0xff] }
   0x2   :  { %111 = vmatpush.msra.mxu2 %v20_v0  ;;  %40 = vmatpush.msra.mxu0 %v20_v0 }
   0x3   :  { %8 = vsyncpa [#allocation3], 0  ;;  %v17_v3 = vld [vmem:[%s197_s1] sm:$0xff]  ;;  %v16_v4 = vld [vmem:[%s196_s0 + $0x8] sm:$0xff]  ;;  %vm21_vm0 = vcmask 261120   ;;  %vm59_vm1 = vcmask 1043456  }
   0x4   :  { %112 = vmatpush.msra.mxu2 %v19_v1  ;;  %41 = vmatpush.msra.mxu0 %v19_v1  ;;  %v15_v5 = vld [vmem:[%s196_s0] sm:$0xff]  ;;  %vm52_vm2 = vcmask 31744   ;;  %s145_s0 = smov [#allocation2]   ;;  %s94_s28 = sshll.u32 %s199_s3, 4  ;;  %s95_s28 = int_to_ptr.hbm [resolvable:$true] %s94_s28 }
   0x5   :  { %v51_v6 = vld [vmem:[%s198_s2] sm:$0xf]  ;;  %s92_s1 = sshll.u32 %s145_s0, 4  ;;  %s146_s2 = smov 128   ;;  %s93_s1 = int_to_ptr.vmem [resolvable:$true] %s92_s1 }
   0x6   :  { %113 = vmatpush.msra.mxu2 %v18_v2  ;;  %42 = vmatpush.msra.mxu0 %v18_v2  ;;  %s147_s29 = smov 8  }
   0x7   :  { %115 = vmatpush.msk.msra.mxu3 %vm59_vm1, %v51_v6  ;;  %108 = vmatpush.msk.msra.mxu1 %vm59_vm1, %v51_v6 }
   0x8   :  { %114 = vmatpush.msra.mxu2 %v17_v3  ;;  %43 = vmatpush.msra.mxu0 %v17_v3 }
   0x9   :  { %107 = vmatmul.msk.f32.vlgmr.msra.gmra.mxu2 %vm21_vm0, %v16_v4  ;;  %106 = vmatmul.msk.f32.vlgmr.msra.gmra.mxu0 %vm21_vm0, %v15_v5 }
  0x86   :  { %v45_v7 = vpop.f32.mrf.mxu0 }
  0x87   :  { %109 = vmatmul.msk.f32.vlgmr.msra.gmra.mxu1 %vm52_vm2, %v45_v7 }
  0x8c   :  { %v48_v8 = vpop.f32.mrf.mxu2 }
  0x8d   :  { %110 = vmatmul.msk.f32.vlgmr.msra.gmra.mxu3 %vm52_vm2, %v48_v8 }
 0x104   :  { %v80_v9 = vpop.f32.mrf.mxu1 }
 0x105   :  { %86 = vst.msk [vmem:[#allocation2] sm:$0xff] %vm21_vm0, %v80_v9 }
 0x110   :  { %v83_v10 = vpop.f32.mrf.mxu3 }
 0x111   :  { %87 = vst.msk [vmem:[#allocation2 + $0x8] sm:$0xff] %vm21_vm0, %v83_v10 }
 0x112   :  { %100 = dma.vmem_to_hbm [thread:$0]  %s93_s1, 256, %s95_s28, [#allocation3], %s146_s2, %s146_s2, %s147_s29  }
 0x113   :  { %143 = dma.done.wait [#allocation3], 256  }
 0x114   :  { %144 = vsyncadd [#allocation3], 4294967040 }
 0x115   :  { %105 = vsyncpa [#allocation3], 1 }

</bundles_post_ra>
